<compile_context>
chip_gen: v7x
topology: tpu7x:2x2x1
jax: 0.10.0
libtpu: 0.0.40
codegen_flags: <defaults>
</compile_context>

<pallas_src>
import math
import jax
import jax.numpy as jnp
from jax.experimental import pallas as pl
from jax.experimental.pallas import tpu as pltpu

HEIGHT = 4
WIDTH = 4
NUM_OBJECTS = 4
N_ACTIONS = 4

INPUT_SIZE = WIDTH * HEIGHT * NUM_OBJECTS   # 64
HIDDEN1 = 100
HIDDEN2 = 100

HIDDEN_PAD = 128    # 100 -> full lane width: lane-dense activations, native MXU tiles
OUT_PAD = 8         # 4 -> 8 only: narrow output (equals full array last dim) => 16x less
                    # HBM writeback than padding to 128, and no zero-padded w3 columns DMA'd
TILE_B_MAX = 2048   # batch tile (rows per grid step)
BATCH_ALIGN = 32    # multiple of the bf16 sublane tile (16) and the f32 tile (8)


def _round_up(a, m):
    return ((a + m - 1) // m) * m


def dqn_kernel(x_ref, w1_ref, b1_ref, w2_ref, b2_ref, w3_ref, b3_ref, o_ref):
    """One batch tile per grid step; weights/biases stay VMEM-resident across steps.

    Matmuls run in the weights' dtype (f32 exact path, or bf16 fast path) with f32
    accumulation; bias adds and ReLUs are always f32.
    """
    wdt = w1_ref.dtype
    x = x_ref[...]
    h1 = jnp.dot(x, w1_ref[...], preferred_element_type=jnp.float32) + b1_ref[...]
    h1 = jnp.maximum(h1, 0.0)                                    # F.relu
    h2 = jnp.dot(h1.astype(wdt), w2_ref[...],
                 preferred_element_type=jnp.float32) + b2_ref[...]
    h2 = jnp.maximum(h2, 0.0)                                    # F.relu
    out = jnp.dot(h2.astype(wdt), w3_ref[...],
                  preferred_element_type=jnp.float32) + b3_ref[...]
    o_ref[...] = out.astype(o_ref.dtype)                         # (tile_b, 8) store


def pad_params(params, weight_dtype=jnp.float32):
    """Zero-pad weights/biases to TPU-friendly shapes (numerically exact).

    weight_dtype=jnp.bfloat16 enables the fast path (halved DMA, native MXU rate);
    biases always stay f32 so the elementwise epilogue is f32 on every TPU generation.
    """
    w1, b1, w2, b2, w3, b3 = params

    def pad2(a, rows, cols, dtype):
        a = jnp.pad(a, ((0, rows - a.shape[0]), (0, cols - a.shape[1])))
        return a.astype(dtype)

    return (
        pad2(w1, INPUT_SIZE, HIDDEN_PAD, weight_dtype), pad2(b1, 1, HIDDEN_PAD, jnp.float32),
        pad2(w2, HIDDEN_PAD, HIDDEN_PAD, weight_dtype), pad2(b2, 1, HIDDEN_PAD, jnp.float32),
        pad2(w3, HIDDEN_PAD, OUT_PAD, weight_dtype),    pad2(b3, 1, OUT_PAD, jnp.float32),
    )


def dqn_forward(x, padded_params):
    """x: (batch, 64) f32. Returns (batch, N_ACTIONS) f32."""
    w1, b1, w2, b2, w3, b3 = padded_params
    batch = x.shape[0]

    # Cast x to the weight dtype (no-op on the exact f32 path; halves x DMA on bf16 path).
    x = x.astype(w1.dtype)

    # Pad batch to the sublane alignment that covers both f32 (8) and bf16 (16) tiles.
    bp = _round_up(max(batch, 1), BATCH_ALIGN)

    # Pick the batch tile: as large as possible, but with >= 2 grid steps when the batch
    # is big enough so v7x's two TensorCores both get work (harmless on v5e/v6e).
    if bp >= 2 * BATCH_ALIGN:
        tile_b = min(TILE_B_MAX, _round_up(pl.cdiv(bp, 2), BATCH_ALIGN))
    else:
        tile_b = bp
    bp = _round_up(bp, tile_b)

    if bp != batch:
        x = jnp.pad(x, ((0, bp - batch), (0, 0)))

    # Constant index_map => weights/biases are fetched once and stay VMEM-resident.
    resident = lambda a: pl.BlockSpec(a.shape, lambda i: (0, 0))

    out = pl.pallas_call(
        dqn_kernel,
        out_shape=jax.ShapeDtypeStruct((bp, OUT_PAD), jnp.float32),
        grid=(bp // tile_b,),
        in_specs=[
            pl.BlockSpec((tile_b, INPUT_SIZE), lambda i: (i, 0)),
            resident(w1), resident(b1),
            resident(w2), resident(b2),
            resident(w3), resident(b3),
        ],
        out_specs=pl.BlockSpec((tile_b, OUT_PAD), lambda i: (i, 0)),
        compiler_params=pltpu.CompilerParams(
            dimension_semantics=("parallel",)),  # shard batch tiles across v7x's 2 TCs
    )(x, w1, b1, w2, b2, w3, b3)

    return out[:batch, :N_ACTIONS]


def init_params(key):
    """Deterministic init mirroring PyTorch nn.Linear default:
    W, b ~ U(-1/sqrt(fan_in), 1/sqrt(fan_in)). Weights stored as (in, out)."""
    def linear(key, fan_in, fan_out):
        kw, kb = jax.random.split(key)
        bound = 1.0 / math.sqrt(fan_in)
        w = jax.random.uniform(kw, (fan_in, fan_out), jnp.float32, -bound, bound)
        b = jax.random.uniform(kb, (1, fan_out), jnp.float32, -bound, bound)
        return w, b

    k1, k2, k3 = jax.random.split(key, 3)
    w1, b1 = linear(k1, INPUT_SIZE, HIDDEN1)
    w2, b2 = linear(k2, HIDDEN1, HIDDEN2)
    w3, b3 = linear(k3, HIDDEN2, N_ACTIONS)
    return (w1, b1, w2, b2, w3, b3)


def _reference(x, params):
    w1, b1, w2, b2, w3, b3 = params
    h = jnp.maximum(x @ w1 + b1, 0.0)
    h = jnp.maximum(h @ w2 + b2, 0.0)
    return h @ w3 + b3


if __name__ == "__main__":
    key = jax.random.PRNGKey(0)
    k_params, k_x1, k_x2 = jax.random.split(key, 3)

    params = init_params(k_params)
    ok = True

    # ---- exact f32 path (matches PyTorch nn.Linear at 1e-5) ----
    padded_f32 = pad_params(params, jnp.float32)

    batch = 2  # DQN per-step usage
    x_small = jax.random.normal(k_x1, (batch, INPUT_SIZE), dtype=jnp.float32)
    out_small = jax.block_until_ready(dqn_forward(x_small, padded_f32))
    ref_small = _reference(x_small, params)
    ok &= out_small.shape == (batch, N_ACTIONS)
    ok &= bool(jnp.allclose(out_small, ref_small, atol=1e-5, rtol=1e-5))

    big = 200  # exercises batch padding + a 2-step grid (both-TC path on v7x)
    x_big = jax.random.normal(k_x2, (big, INPUT_SIZE), dtype=jnp.float32)
    out_big = jax.block_until_ready(dqn_forward(x_big, padded_f32))
    ref_big = _reference(x_big, params)
    ok &= out_big.shape == (big, N_ACTIONS)
    ok &= bool(jnp.allclose(out_big, ref_big, atol=1e-5, rtol=1e-5))

    # ---- bf16 fast path (halved DMA, native MXU rate); looser tolerance by design ----
    padded_bf16 = pad_params(params, jnp.bfloat16)
    out_bf16 = jax.block_until_ready(dqn_forward(x_big, padded_bf16))
    ok &= out_bf16.shape == (big, N_ACTIONS)
    ok &= bool(jnp.allclose(out_bf16, ref_big, atol=5e-2, rtol=5e-2))

    assert ok
    print("KERNEL_OK")
</pallas_src>

<mosaic_0001>
module attributes {stable_mosaic.version = 11 : i64} {
  func.func @dqn_kernel(%arg0: i32, %arg1: memref<32x64xf32, #tpu.memory_space<vmem>>, %arg2: memref<64x128xf32, #tpu.memory_space<vmem>>, %arg3: memref<1x128xf32, #tpu.memory_space<vmem>>, %arg4: memref<128x128xf32, #tpu.memory_space<vmem>>, %arg5: memref<1x128xf32, #tpu.memory_space<vmem>>, %arg6: memref<128x8xf32, #tpu.memory_space<vmem>>, %arg7: memref<1x8xf32, #tpu.memory_space<vmem>>, %arg8: memref<32x8xf32, #tpu.memory_space<vmem>>) attributes {dimension_semantics = [#tpu.dimension_semantics<parallel>], iteration_bounds = array<i64: 1>, scalar_prefetch = 0 : i64, scratch_operands = 0 : i64, tpu.core_type = #tpu.core_type<tc>, window_params = [{transform_indices = @transform_0, window_bounds = array<i64: 32, 64>}, {pipeline_mode = #tpu.pipeline_mode<synchronous>, transform_indices = @transform_1, window_bounds = array<i64: 64, 128>}, {pipeline_mode = #tpu.pipeline_mode<synchronous>, transform_indices = @transform_2, window_bounds = array<i64: 1, 128>}, {pipeline_mode = #tpu.pipeline_mode<synchronous>, transform_indices = @transform_3, window_bounds = array<i64: 128, 128>}, {pipeline_mode = #tpu.pipeline_mode<synchronous>, transform_indices = @transform_4, window_bounds = array<i64: 1, 128>}, {pipeline_mode = #tpu.pipeline_mode<synchronous>, transform_indices = @transform_5, window_bounds = array<i64: 128, 8>}, {pipeline_mode = #tpu.pipeline_mode<synchronous>, transform_indices = @transform_6, window_bounds = array<i64: 1, 8>}, {transform_indices = @transform_7, window_bounds = array<i64: 32, 8>}]} {
    %c0 = arith.constant 0 : index
    %c0_0 = arith.constant 0 : index
    %0 = vector.load %arg1[%c0, %c0_0] : memref<32x64xf32, #tpu.memory_space<vmem>>, vector<32x64xf32>
    %c0_1 = arith.constant 0 : index
    %c0_2 = arith.constant 0 : index
    %1 = vector.load %arg2[%c0_1, %c0_2] : memref<64x128xf32, #tpu.memory_space<vmem>>, vector<64x128xf32>
    %cst = arith.constant dense<0.000000e+00> : vector<32x128xf32>
    %2 = tpu.matmul %0, %1, %cst {dimension_numbers = #tpu.dot_dimension_numbers<[1], [0], [0], [1], [0, 0, 1, 1], [], []>} : vector<32x64xf32>, vector<64x128xf32>, vector<32x128xf32> -> vector<32x128xf32>
    %c0_3 = arith.constant 0 : index
    %c0_4 = arith.constant 0 : index
    %3 = vector.load %arg3[%c0_3, %c0_4] : memref<1x128xf32, #tpu.memory_space<vmem>>, vector<1x128xf32>
    %4 = vector.broadcast %3 : vector<1x128xf32> to vector<32x128xf32>
    %5 = arith.addf %2, %4 : vector<32x128xf32>
    %cst_5 = arith.constant 0.000000e+00 : f32
    %6 = vector.broadcast %cst_5 : f32 to vector<32x128xf32>
    %7 = arith.maximumf %5, %6 : vector<32x128xf32>
    %c0_6 = arith.constant 0 : index
    %c0_7 = arith.constant 0 : index
    %8 = vector.load %arg4[%c0_6, %c0_7] : memref<128x128xf32, #tpu.memory_space<vmem>>, vector<128x128xf32>
    %cst_8 = arith.constant dense<0.000000e+00> : vector<32x128xf32>
    %9 = tpu.matmul %7, %8, %cst_8 {dimension_numbers = #tpu.dot_dimension_numbers<[1], [0], [0], [1], [0, 0, 1, 1], [], []>} : vector<32x128xf32>, vector<128x128xf32>, vector<32x128xf32> -> vector<32x128xf32>
    %c0_9 = arith.constant 0 : index
    %c0_10 = arith.constant 0 : index
    %10 = vector.load %arg5[%c0_9, %c0_10] : memref<1x128xf32, #tpu.memory_space<vmem>>, vector<1x128xf32>
    %11 = vector.broadcast %10 : vector<1x128xf32> to vector<32x128xf32>
    %12 = arith.addf %9, %11 : vector<32x128xf32>
    %cst_11 = arith.constant 0.000000e+00 : f32
    %13 = vector.broadcast %cst_11 : f32 to vector<32x128xf32>
    %14 = arith.maximumf %12, %13 : vector<32x128xf32>
    %c0_12 = arith.constant 0 : index
    %c0_13 = arith.constant 0 : index
    %15 = vector.load %arg6[%c0_12, %c0_13] : memref<128x8xf32, #tpu.memory_space<vmem>>, vector<128x8xf32>
    %cst_14 = arith.constant dense<0.000000e+00> : vector<32x8xf32>
    %16 = tpu.matmul %14, %15, %cst_14 {dimension_numbers = #tpu.dot_dimension_numbers<[1], [0], [0], [1], [0, 0, 1, 1], [], []>} : vector<32x128xf32>, vector<128x8xf32>, vector<32x8xf32> -> vector<32x8xf32>
    %c0_15 = arith.constant 0 : index
    %c0_16 = arith.constant 0 : index
    %17 = vector.load %arg7[%c0_15, %c0_16] : memref<1x8xf32, #tpu.memory_space<vmem>>, vector<1x8xf32>
    %18 = vector.broadcast %17 : vector<1x8xf32> to vector<32x8xf32>
    %19 = arith.addf %16, %18 : vector<32x8xf32>
    %c0_17 = arith.constant 0 : index
    %c0_18 = arith.constant 0 : index
    %20 = vector.load %arg8[%c0_17, %c0_18] : memref<32x8xf32, #tpu.memory_space<vmem>>, vector<32x8xf32>
    tpu.vector_store %arg8[%c0_17, %c0_18], %19 {strides = array<i32>} : memref<32x8xf32, #tpu.memory_space<vmem>>, vector<32x8xf32>,
    return
  }
  func.func @transform_0(%arg0: i32) -> (i32, i32) {
    %c0_i32 = arith.constant 0 : i32
    %c0_i32_0 = arith.constant 0 : i32
    return %arg0, %c0_i32 : i32, i32
  }
  func.func @transform_1(%arg0: i32) -> (i32, i32) {
    %c0_i32 = arith.constant 0 : i32
    %c0_i32_0 = arith.constant 0 : i32
    %c0_i32_1 = arith.constant 0 : i32
    return %c0_i32, %c0_i32_0 : i32, i32
  }
  func.func @transform_2(%arg0: i32) -> (i32, i32) {
    %c0_i32 = arith.constant 0 : i32
    %c0_i32_0 = arith.constant 0 : i32
    %c0_i32_1 = arith.constant 0 : i32
    return %c0_i32, %c0_i32_0 : i32, i32
  }
  func.func @transform_3(%arg0: i32) -> (i32, i32) {
    %c0_i32 = arith.constant 0 : i32
    %c0_i32_0 = arith.constant 0 : i32
    %c0_i32_1 = arith.constant 0 : i32
    return %c0_i32, %c0_i32_0 : i32, i32
  }
  func.func @transform_4(%arg0: i32) -> (i32, i32) {
    %c0_i32 = arith.constant 0 : i32
    %c0_i32_0 = arith.constant 0 : i32
    %c0_i32_1 = arith.constant 0 : i32
    return %c0_i32, %c0_i32_0 : i32, i32
  }
  func.func @transform_5(%arg0: i32) -> (i32, i32) {
    %c0_i32 = arith.constant 0 : i32
    %c0_i32_0 = arith.constant 0 : i32
    %c0_i32_1 = arith.constant 0 : i32
    return %c0_i32, %c0_i32_0 : i32, i32
  }
  func.func @transform_6(%arg0: i32) -> (i32, i32) {
    %c0_i32 = arith.constant 0 : i32
    %c0_i32_0 = arith.constant 0 : i32
    %c0_i32_1 = arith.constant 0 : i32
    return %c0_i32, %c0_i32_0 : i32, i32
  }
  func.func @transform_7(%arg0: i32) -> (i32, i32) {
    %c0_i32 = arith.constant 0 : i32
    %c0_i32_0 = arith.constant 0 : i32
    return %arg0, %c0_i32 : i32, i32
  }
}

</mosaic_0001>

<bundles_post_ra>
// kernel: tpu_custom_call.1
= control target key start
LH: loop header
LB: loop body
LE: loop exit
PB: predicated region body
PF: predicated region fallthrough
CT: control target
= control target key end

     0   :  { %12 = vsyncpa [#allocation3], 0  ;;  %s884_s0 = inlined_call_operand.hbm [shape: f32[32,64], index: 0, kind: input, shape index: {}]   ;;  %s885_s1 = inlined_call_operand.hbm [shape: f32[64,128], index: 1, kind: input, shape index: {}]   ;;  %s886_s2 = inlined_call_operand.vmem [shape: f32[1,128], index: 2, kind: input, shape index: {}]   ;;  %s887_s3 = inlined_call_operand.vmem [shape: f32[128,128], index: 3, kind: input, shape index: {}]   ;;  %s888_s4 = inlined_call_operand.vmem [shape: f32[1,128], index: 4, kind: input, shape index: {}]   ;;  %s889_s5 = inlined_call_operand.vmem [shape: f32[128,8], index: 5, kind: input, shape index: {}]   ;;  %s890_s6 = inlined_call_operand.vmem [shape: f32[1,8], index: 6, kind: input, shape index: {}]   ;;  %s891_s7 = inlined_call_operand.vmem [shape: f32[32,8], index: 7, kind: output, shape index: {}]  }
   0x1   :  { %13 = vsyncpa [#allocation5], 0  ;;  %s695_s24 = smov [#allocation2]   ;;  %s647_s28 = scalar_lea.hbm %s884_s0, 512 }
   0x2   :  { %s19_s25 = sshll.u32 %s695_s24, 4  ;;  %p648_p0 = scmp.ne.s32.totalorder %s884_s0, %s647_s28  ;;  %s20_s25 = int_to_ptr.vmem [resolvable:$true] %s19_s25 }
   0x3   :  { %p651_p1 = scmp.lt.u32.totalorder %s647_s28, %s884_s0 }
   0x5   :  { %p653_p2 = pnand %p651_p1, %p648_p0 }
   0x7   :  { %656 = shalt.err (!%p653_p2)
}
   0x8   :  { %s657_s10 = scalar_lea.vmem %s20_s25, 512  ;;  %p662_p4 = scmp.lt.s32.totalorder %s20_s25, %s20_s25 }
   0x9   :  { %p658_p3 = scmp.ne.s32.totalorder %s20_s25, %s657_s10  ;;  %p663_p5 = scmp.lt.s32.totalorder %s657_s10, %s657_s10 }
   0xb   :  { %p664_p6 = por %p663_p5, %p662_p4 }
   0xd   :  { %p665_p7 = pnand %p664_p6, %p658_p3 }
   0xf   :  { %668 = shalt.err (!%p665_p7)
}
  0x10   :  { %s696_s11 = smov 128   ;;  %s697_s12 = smov 8  }
  0x11   :  { %25 = dma.hbm_to_vmem [thread:$0]  %s884_s0, 512, %s20_s25, [#allocation3], %s696_s11, %s696_s11, %s697_s12  }
  0x12   :  { %s698_s15 = smov [#allocation4]   ;;  %s669_s19 = scalar_lea.hbm %s885_s1, 1024 }
  0x13   :  { %s31_s16 = sshll.u32 %s698_s15, 4  ;;  %p670_p8 = scmp.ne.s32.totalorder %s885_s1, %s669_s19  ;;  %s32_s16 = int_to_ptr.vmem [resolvable:$true] %s31_s16 }
  0x14   :  { %p673_p9 = scmp.lt.u32.totalorder %s669_s19, %s885_s1 }
  0x16   :  { %p675_p10 = pnand %p673_p9, %p670_p8 }
  0x18   :  { %678 = shalt.err (!%p675_p10)
}
  0x19   :  { %s679_s24 = scalar_lea.vmem %s32_s16, 1024  ;;  %p684_p12 = scmp.lt.s32.totalorder %s32_s16, %s32_s16 }
  0x1a   :  { %p680_p11 = scmp.ne.s32.totalorder %s32_s16, %s679_s24  ;;  %p685_p13 = scmp.lt.s32.totalorder %s679_s24, %s679_s24 }
  0x1c   :  { %p686_p0 = por %p685_p13, %p684_p12 }
  0x1e   :  { %p687_p1 = pnand %p686_p0, %p680_p11 }
  0x20   :  { %690 = shalt.err (!%p687_p1)
}
  0x21   :  { %37 = dma.hbm_to_vmem [thread:$0]  %s885_s1, 1024, %s32_s16, [#allocation5], %s696_s11, %s696_s11, %s697_s12  }
  0x22   :  { %691 = dma.done.wait [#allocation3], 512  }
  0x23   :  { %692 = vsyncadd [#allocation3], 4294966784 }
  0x24   :  { %693 = dma.done.wait [#allocation5], 1024  }
  0x25   :  { %694 = vsyncadd [#allocation5], 4294966272  ;;  %v58_v0 = vld [vmem:[#allocation4] sm:$0xff]  ;;  %v59_v1 = vld [vmem:[#allocation4 + $0x8] sm:$0xff]  ;;  %vm73_vm0 = vcmask 523264   ;;  %vm395_vm1 = vcmask 64512  }
  0x26   :  { %v60_v2 = vld [vmem:[#allocation4 + $0x10] sm:$0xff]  ;;  %v563_v3 = vpack.c.bf16 %v59_v1, %v58_v0  ;;  %v61_v4 = vld [vmem:[#allocation4 + $0x18] sm:$0xff]  ;;  %v62_v6 = vld [vmem:[#allocation4 + $0x20] sm:$0xff] }
  0x27   :  { %v567_v5 = vpack.c.bf16 %v61_v4, %v60_v2  ;;  %v63_v7 = vld [vmem:[#allocation4 + $0x28] sm:$0xff]  ;;  %v54_v8 = vld [vmem:[#allocation2] sm:$0xff]  ;;  %v177_v11 = vld [vmem:[%s887_s3 + $0x10] sm:$0xff] }
  0x28   :  { %564 = vmatprep.subr.bf16.mxu0 %v563_v3  ;;  %481 = vmatprep.mubr.msk.f32.mxu0 %vm73_vm0, %v54_v8  ;;  %v175_v9 = vld [vmem:[%s887_s3] sm:$0xff]  ;;  %v176_v10 = vld [vmem:[%s887_s3 + $0x8] sm:$0xff]  ;;  %v571_v12 = vpack.c.bf16 %v63_v7, %v62_v6  ;;  %v64_v13 = vld [vmem:[#allocation4 + $0x30] sm:$0xff] }
  0x29   :  { %566 = vmatpush3.bf16.msra.mxu0 %v563_v3  ;;  %v579_v14 = vpack.c.bf16 %v176_v10, %v175_v9  ;;  %v178_v15 = vld [vmem:[%s887_s3 + $0x18] sm:$0xff]  ;;  %v179_v18 = vld [vmem:[%s887_s3 + $0x20] sm:$0xff]  ;;  %v180_v19 = vld [vmem:[%s887_s3 + $0x28] sm:$0xff] }
  0x2a   :  { %568 = vmatprep.subr.bf16.mxu0 %v567_v5  ;;  %v65_v16 = vld [vmem:[#allocation4 + $0x38] sm:$0xff]  ;;  %v583_v17 = vpack.c.bf16 %v178_v15, %v177_v11  ;;  %v587_v21 = vpack.c.bf16 %v180_v19, %v179_v18  ;;  %v181_v22 = vld [vmem:[%s887_s3 + $0x30] sm:$0xff]  ;;  %v183_v25 = vld [vmem:[%s887_s3 + $0x40] sm:$0xff] }
  0x2b   :  { %580 = vmatprep.subr.bf16.mxu1 %v579_v14  ;;  %v575_v20 = vpack.c.bf16 %v65_v16, %v64_v13  ;;  %v182_v23 = vld [vmem:[%s887_s3 + $0x38] sm:$0xff]  ;;  %v184_v26 = vld [vmem:[%s887_s3 + $0x48] sm:$0xff]  ;;  %v56_v28 = vld [vmem:[#allocation2 + $0x10] sm:$0xff] }
  0x2c   :  { %582 = vmatpush3.bf16.msra.mxu1 %v579_v14  ;;  %v591_v24 = vpack.c.bf16 %v182_v23, %v181_v22  ;;  %v55_v27 = vld [vmem:[#allocation2 + $0x8] sm:$0xff]  ;;  %v595_v29 = vpack.c.bf16 %v184_v26, %v183_v25  ;;  %v185_v30 = vld [vmem:[%s887_s3 + $0x50] sm:$0xff]  ;;  %v186_v31 = vld [vmem:[%s887_s3 + $0x58] sm:$0xff] }
  0x2d   :  { %570 = vmatpush3.bf16.msra.mxu0 %v567_v5  ;;  %584 = vmatprep.subr.bf16.mxu1 %v583_v17  ;;  %v57_v32 = vld [vmem:[#allocation2 + $0x18] sm:$0xff]  ;;  %v599_v33 = vpack.c.bf16 %v186_v31, %v185_v30  ;;  %v187_v34 = vld [vmem:[%s887_s3 + $0x60] sm:$0xff]  ;;  %v188_v35 = vld [vmem:[%s887_s3 + $0x68] sm:$0xff] }
  0x2e   :  { %572 = vmatprep.subr.bf16.mxu0 %v571_v12  ;;  %v603_v36 = vpack.c.bf16 %v188_v35, %v187_v34  ;;  %v189_v37 = vld [vmem:[%s887_s3 + $0x70] sm:$0xff]  ;;  %v190_v38 = vld [vmem:[%s887_s3 + $0x78] sm:$0xff]  ;;  %v287_v40 = vld [vmem:[%s889_s5] sm:$0xff] }
  0x2f   :  { %v607_v39 = vpack.c.bf16 %v190_v38, %v189_v37  ;;  %v288_v41 = vld [vmem:[%s889_s5 + $0x8] sm:$0xff]  ;;  %v289_v42 = vld [vmem:[%s889_s5 + $0x10] sm:$0xff]  ;;  %v290_v44 = vld [vmem:[%s889_s5 + $0x18] sm:$0xff] }
  0x30   :  { %586 = vmatpush3.bf16.msra.mxu1 %v583_v17  ;;  %v611_v43 = vpack.c.bf16 %v288_v41, %v287_v40  ;;  %v615_v45 = vpack.c.bf16 %v290_v44, %v289_v42  ;;  %v291_v46 = vld [vmem:[%s889_s5 + $0x20] sm:$0xff]  ;;  %v292_v47 = vld [vmem:[%s889_s5 + $0x28] sm:$0xff]  ;;  %v293_v49 = vld [vmem:[%s889_s5 + $0x30] sm:$0xff] }
  0x31   :  { %574 = vmatpush3.bf16.msra.mxu0 %v571_v12  ;;  %588 = vmatprep.subr.bf16.mxu1 %v587_v21  ;;  %v619_v48 = vpack.c.bf16 %v292_v47, %v291_v46  ;;  %v294_v50 = vld [vmem:[%s889_s5 + $0x38] sm:$0xff]  ;;  %v295_v52 = vld [vmem:[%s889_s5 + $0x40] sm:$0xff]  ;;  %v296_v53 = vld [vmem:[%s889_s5 + $0x48] sm:$0xff] }
  0x32   :  { %576 = vmatprep.subr.bf16.mxu0 %v575_v20  ;;  %v623_v51 = vpack.c.bf16 %v294_v50, %v293_v49  ;;  %v627_v54 = vpack.c.bf16 %v296_v53, %v295_v52  ;;  %v297_v55 = vld [vmem:[%s889_s5 + $0x50] sm:$0xff]  ;;  %v298_v56 = vld [vmem:[%s889_s5 + $0x58] sm:$0xff]  ;;  %v299_v58 = vld [vmem:[%s889_s5 + $0x60] sm:$0xff] }
  0x33   :  { %v631_v57 = vpack.c.bf16 %v298_v56, %v297_v55  ;;  %v300_v59 = vld [vmem:[%s889_s5 + $0x68] sm:$0xff]  ;;  %v406_v61 = vld [vmem:[%s886_s2] ss:$0 sm:$0xff]  ;;  %v301_v10 = vld [vmem:[%s889_s5 + $0x70] sm:$0xff] }
  0x34   :  { %590 = vmatpush3.bf16.msra.mxu1 %v587_v21  ;;  %v635_v60 = vpack.c.bf16 %v300_v59, %v299_v58  ;;  %v302_v11 = vld [vmem:[%s889_s5 + $0x78] sm:$0xff]  ;;  %v411_v13 = vld [vmem:[%s888_s4] ss:$0 sm:$0xff] }
  0x35   :  { %578 = vmatpush3.bf16.msra.mxu0 %v575_v20  ;;  %592 = vmatprep.subr.bf16.mxu1 %v591_v24  ;;  %v639_v12 = vpack.c.bf16 %v302_v11, %v301_v10  ;;  %v412_v26 = vld [vmem:[%s890_s6] ss:$0 sm:$0xff] }
  0x36   :  { %612 = vmatprep.subr.bf16.mxu0 %v611_v43 }
  0x38   :  { %482 = vmatmul.mubr.msk.f32.vlgmr.msra.gmra.mrb[0].mxu0 %vm73_vm0, %v55_v27  ;;  %594 = vmatpush3.bf16.msra.mxu1 %v591_v24 }
  0x39   :  { %484 = vmatprep.mubr.msk.f32.mxu0 %vm73_vm0, %v56_v28  ;;  %596 = vmatprep.subr.bf16.mxu1 %v595_v29 }
  0x3a   :  { %614 = vmatpush3.bf16.msra.mxu0 %v611_v43 }
  0x3b   :  { %616 = vmatprep.subr.bf16.mxu0 %v615_v45 }
  0x3c   :  { %485 = vmatmul.mubr.msk.f32.gmra.mrb[2].mxu0 %vm73_vm0, %v57_v32  ;;  %598 = vmatpush3.bf16.msra.mxu1 %v595_v29 }
  0x3d   :  { %600 = vmatprep.subr.bf16.mxu1 %v599_v33 }
  0x3e   :  { %618 = vmatpush3.bf16.msra.mxu0 %v615_v45 }
  0x3f   :  { %620 = vmatprep.subr.bf16.mxu0 %v619_v48 }
  0x40   :  { %602 = vmatpush3.bf16.msra.mxu1 %v599_v33 }
  0x41   :  { %604 = vmatprep.subr.bf16.mxu1 %v603_v36 }
  0x42   :  { %622 = vmatpush3.bf16.msra.mxu0 %v619_v48 }
  0x43   :  { %624 = vmatprep.subr.bf16.mxu0 %v623_v51 }
  0x44   :  { %606 = vmatpush3.bf16.msra.mxu1 %v603_v36 }
  0x45   :  { %608 = vmatprep.subr.bf16.mxu1 %v607_v39 }
  0x46   :  { %626 = vmatpush3.bf16.msra.mxu0 %v623_v51 }
  0x47   :  { %628 = vmatprep.subr.bf16.mxu0 %v627_v54 }
  0x48   :  { %610 = vmatpush3.bf16.msra.mxu1 %v607_v39 }
  0x4a   :  { %630 = vmatpush3.bf16.msra.mxu0 %v627_v54 }
  0x4b   :  { %632 = vmatprep.subr.bf16.mxu0 %v631_v57 }
  0x4e   :  { %634 = vmatpush3.bf16.msra.mxu0 %v631_v57 }
  0x4f   :  { %636 = vmatprep.subr.bf16.mxu0 %v635_v60 }
  0x52   :  { %638 = vmatpush3.bf16.msra.mxu0 %v635_v60 }
  0x53   :  { %640 = vmatprep.subr.bf16.mxu0 %v639_v12 }
  0x56   :  { %642 = vmatpush3.bf16.msra.mxu0 %v639_v12 }
 0x10b   :  { %v483_v62 = vpop.f32.mrb[0].mxu0 }
 0x10c   :  { %v158_v63 = vadd.f32 %v483_v62, %v406_v61  ;;  %v152_v0 = vpop.f32.mrb[1].mxu0 }
 0x10d   :  { %v153_v1 = vadd.f32 %v406_v61, %v152_v0 }
 0x10e   :  { %v172_v4 = vmax.f32 %v158_v63, 0.0 }
 0x10f   :  { %v486_v2 = vpop.f32.mrb[2].mxu0  ;;  %v171_v3 = vmax.f32 %v153_v1, 0.0 }
 0x110   :  { %v168_v5 = vadd.f32 %v486_v2, %v406_v61  ;;  %v162_v6 = vpop.f32.mrb[3].mxu0 }
 0x111   :  { %v163_v7 = vadd.f32 %v406_v61, %v162_v6  ;;  %519 = vmatprep.mubr.f32.mxu1 %v171_v3 }
 0x112   :  { %520 = vmatmul.mubr.f32.vlgmr.msra.gmra.mrb[0].mxu1 %v172_v4  ;;  %v174_v9 = vmax.f32 %v168_v5, 0.0 }
 0x113   :  { %v173_v8 = vmax.f32 %v163_v7, 0.0 }
 0x115   :  { %522 = vmatprep.mubr.f32.mxu1 %v173_v8 }
 0x116   :  { %523 = vmatmul.mubr.f32.gmra.mrb[2].mxu1 %v174_v9 }
 0x1e5   :  { %v521_v14 = vpop.f32.mrb[0].mxu1 }
 0x1e6   :  { %v270_v15 = vadd.f32 %v521_v14, %v411_v13  ;;  %v264_v16 = vpop.f32.mrb[1].mxu1 }
 0x1e7   :  { %v265_v17 = vadd.f32 %v411_v13, %v264_v16 }
 0x1e8   :  { %v284_v20 = vmax.f32 %v270_v15, 0.0 }
 0x1e9   :  { %v283_v18 = vmax.f32 %v265_v17, 0.0  ;;  %v524_v19 = vpop.f32.mrb[2].mxu1 }
 0x1ea   :  { %v280_v21 = vadd.f32 %v524_v19, %v411_v13  ;;  %v274_v22 = vpop.f32.mrb[3].mxu1 }
 0x1eb   :  { %v275_v23 = vadd.f32 %v411_v13, %v274_v22  ;;  %557 = vmatprep.mubr.f32.mxu0 %v283_v18 }
 0x1ec   :  { %558 = vmatmul.mubr.f32.vlgmr.msra.gmra.mrb[4].mxu0 %v284_v20  ;;  %v286_v25 = vmax.f32 %v280_v21, 0.0 }
 0x1ed   :  { %v285_v24 = vmax.f32 %v275_v23, 0.0 }
 0x1ef   :  { %560 = vmatprep.mubr.f32.mxu0 %v285_v24 }
 0x1f0   :  { %561 = vmatmul.mubr.f32.gmra.mrb[6].mxu0 %v286_v25 }
 0x2bf   :  { %v559_v27 = vpop.f32.mrb[4].mxu0 }
 0x2c0   :  { %v382_v28 = vadd.f32 %v559_v27, %v412_v26  ;;  %v376_v29 = vpop.f32.mrb[5].mxu0 }
 0x2c1   :  { %v377_v30 = vadd.f32 %v412_v26, %v376_v29 }
 0x2c2   :  { %397 = vst.msk [vmem:[%s891_s7 + $0x8] sm:$0xff] %vm395_vm1, %v382_v28 }
 0x2c3   :  { %396 = vst.msk [vmem:[%s891_s7] sm:$0xff] %vm395_vm1, %v377_v30  ;;  %v562_v31 = vpop.f32.mrb[6].mxu0 }
 0x2c4   :  { %v392_v32 = vadd.f32 %v562_v31, %v412_v26  ;;  %v386_v33 = vpop.f32.mrb[7].mxu0 }
 0x2c5   :  { %v387_v34 = vadd.f32 %v412_v26, %v386_v33 }
 0x2c6   :  { %399 = vst.msk [vmem:[%s891_s7 + $0x18] sm:$0xff] %vm395_vm1, %v392_v32 }
 0x2c7   :  { %398 = vst.msk [vmem:[%s891_s7 + $0x10] sm:$0xff] %vm395_vm1, %v387_v34 }
 0x2c8   :  { %404 = vsyncpa [#allocation3], 1 }
 0x2c9   :  { %405 = vsyncpa [#allocation5], 1 }

</bundles_post_ra>
